<compile_context>
chip_gen: v5e
topology: v5e:2x2
jax: 0.10.0
libtpu: 0.0.40
codegen_flags: <defaults>
</compile_context>

<pallas_src>
import functools

import jax
import jax.numpy as jnp
from jax.experimental import pallas as pl
from jax.experimental.pallas import tpu as pltpu

_LANE = 128
_SUBLANE = 8
_MAX_BLOCK_BATCH = 8192      # batch rows per grid step (see VMEM note above)
_MAX_SUB_BATCH = 512         # register-blocking sub-slab (lanes of the activations)


def _round_up(n, m):
    return ((n + m - 1) // m) * m


def _cdiv(a, b):
    return (a + b - 1) // b


def ffnn_kernel(x_ref, w_ref, b_ref, o_ref, *,
                n_layers, in_features, out_features, sub_batch, compute_dtype):
    """One batch tile.

    x_ref: [tb, in]   native row-major batch tile (lane dim == in_features)
    w_ref: [L, H, H]  zero-padded weights, PyTorch [out, in] layout (resident)
    b_ref: [L, H, 1]  zero-padded biases (resident)
    o_ref: [tb, out]  softmax probabilities, native row-major
    """
    n_sub = x_ref.shape[0] // sub_batch

    def slab(s, carry):
        off = pl.multiple_of(s * sub_batch, sub_batch)
        x_slab = x_ref[pl.ds(off, sub_batch), :].astype(compute_dtype)    # [SB, in]

        # Layer 0: contract both operands over the feature axis; this folds the
        # [SB,in] -> [in,SB] transpose into the MXU op and yields batch-on-lanes
        # activations [H, SB] (lane-dense for the rest of the chain).
        w0 = w_ref[0, :, :in_features].astype(compute_dtype)             # [H, in]
        h = jax.lax.dot_general(w0, x_slab, (((1,), (1,)), ((), ())),
                                preferred_element_type=jnp.float32)      # [H, SB]
        h = jnp.maximum(h + b_ref[0], 0.0)

        for l in range(1, n_layers - 1):                                  # hidden layers
            h = jnp.dot(w_ref[l].astype(compute_dtype), h.astype(compute_dtype),
                        preferred_element_type=jnp.float32)
            h = jnp.maximum(h + b_ref[l], 0.0)

        w_last = w_ref[n_layers - 1, :out_features, :].astype(compute_dtype)
        b_last = b_ref[n_layers - 1, :out_features, :]
        logits = jnp.dot(w_last, h.astype(compute_dtype),
                         preferred_element_type=jnp.float32) + b_last     # [out, SB]

        # Numerically stable softmax over features (axis 0 here == torch dim=1).
        m = jnp.max(logits, axis=0, keepdims=True)
        e = jnp.exp(logits - m)
        denom = jnp.sum(e, axis=0, keepdims=True)
        inv = pl.reciprocal(denom, approx=True)        # EUP vrcp, free bundle slot
        inv = inv * (2.0 - denom * inv)                # one Newton step -> ~f32 exact
        probs = e * inv                                # [out, SB]

        # One small in-kernel transpose per slab -> native [SB, out] store.  The
        # 8-lane store is masked, but it replaces an entire extra HBM pass that
        # the old wrapper-side un-transpose required.
        o_ref[pl.ds(off, sub_batch), :] = probs.T.astype(o_ref.dtype)
        return carry

    jax.lax.fori_loop(0, n_sub, slab, 0, unroll=True)


def pack_params(params):
    """Pack per-layer (W[out,in], b[out]) ONCE into zero-padded resident slabs."""
    n_layers = len(params)
    in_features = params[0][0].shape[1]
    out_features = params[-1][0].shape[0]
    hdim = max(max(w.shape) for w, _ in params)
    w_packed = jnp.zeros((n_layers, hdim, hdim), jnp.float32)
    b_packed = jnp.zeros((n_layers, hdim, 1), jnp.float32)
    for l, (w, b) in enumerate(params):
        od, id_ = w.shape
        w_packed = w_packed.at[l, :od, :id_].set(w.astype(jnp.float32))
        b_packed = b_packed.at[l, :od, 0].set(b.astype(jnp.float32))
    return dict(w=w_packed, b=b_packed, n_layers=n_layers, hidden=hdim,
                in_features=in_features, out_features=out_features)


def _pick_block_batch(batch, block_batch):
    tb = _MAX_BLOCK_BATCH if block_batch is None else int(block_batch)
    tb = max(1, min(tb, _MAX_BLOCK_BATCH))
    # v7x megacore: keep >= 2 grid steps so ("parallel",) can use both TCs.
    if batch > _LANE:
        tb = min(tb, _round_up(_cdiv(batch, 2), _LANE))
    tb = min(tb, batch)                    # a block must not exceed the array extent
    if tb < batch:                         # partial tiling needs sublane-aligned blocks
        tb = max(_SUBLANE, (tb // _SUBLANE) * _SUBLANE)
    return tb


def _pick_sub_batch(tb):
    sub = _MAX_SUB_BATCH
    while sub > _SUBLANE and tb % sub:
        sub //= 2
    return sub if tb % sub == 0 else tb


def generative_ffnn_forward(x, packed, *, block_batch=None, use_bf16=False):
    """x: [batch, in_features] f32.  packed: output of pack_params()."""
    batch, in_features = x.shape
    assert in_features == packed["in_features"], "input width mismatch"
    n_layers = packed["n_layers"]
    hdim = packed["hidden"]
    out_features = packed["out_features"]

    tb = _pick_block_batch(batch, block_batch)
    sub = _pick_sub_batch(tb)
    grid = (_cdiv(batch, tb),)            # ragged last block handled by Pallas masking

    # Native (tb,16)/(tb,8) blocks lane-pad to 128 in VMEM (~1 KiB/row/buffer,
    # double-buffered); raise the scoped VMEM limit so v5e's 16 MiB default is
    # not the constraint, while staying under v7x's 64 MiB physical VMEM.
    vmem_limit = int(min(max(2048 * tb + (8 << 20), 32 << 20), 64 << 20))

    cost = pl.CostEstimate(
        flops=2 * batch * (hdim * in_features
                           + (n_layers - 2) * hdim * hdim
                           + out_features * hdim),
        transcendentals=batch * (out_features + 1),
        bytes_accessed=4 * (batch * (in_features + out_features)
                            + packed["w"].size + packed["b"].size),
    )

    kernel = functools.partial(
        ffnn_kernel, n_layers=n_layers, in_features=in_features,
        out_features=out_features, sub_batch=sub,
        compute_dtype=jnp.bfloat16 if use_bf16 else jnp.float32)

    return pl.pallas_call(
        kernel,
        out_shape=jax.ShapeDtypeStruct((batch, out_features), jnp.float32),
        grid=grid,
        in_specs=[
            pl.BlockSpec((tb, in_features), lambda i: (i, 0)),           # streamed x tile
            pl.BlockSpec((n_layers, hdim, hdim), lambda i: (0, 0, 0)),   # resident weights
            pl.BlockSpec((n_layers, hdim, 1), lambda i: (0, 0, 0)),      # resident biases
        ],
        out_specs=pl.BlockSpec((tb, out_features), lambda i: (i, 0)),
        compiler_params=pltpu.CompilerParams(
            dimension_semantics=("parallel",),    # v7x: shard batch tiles over 2 TCs
            vmem_limit_bytes=vmem_limit),
        cost_estimate=cost,
    )(x.astype(jnp.float32), packed["w"], packed["b"])


def init_params(key, input_size, hidden_size, output_size, num_layers):
    """PyTorch nn.Linear-style init: U(-1/sqrt(fan_in), 1/sqrt(fan_in)), W is [out, in]."""
    dims = [input_size] + [hidden_size] * num_layers + [output_size]
    params = []
    for i in range(len(dims) - 1):
        fan_in, fan_out = dims[i], dims[i + 1]
        key, kw, kb = jax.random.split(key, 3)
        bound = 1.0 / (fan_in ** 0.5)
        w = jax.random.uniform(kw, (fan_out, fan_in), jnp.float32, -bound, bound)
        b = jax.random.uniform(kb, (fan_out,), jnp.float32, -bound, bound)
        params.append((w, b))
    return params


def reference_forward(x, params):
    h = x
    for i, (w, b) in enumerate(params):
        h = jnp.dot(h, w.T, precision=jax.lax.Precision.HIGHEST) + b
        if i < len(params) - 1:
            h = jnp.maximum(h, 0.0)
    return jax.nn.softmax(h, axis=1)


if __name__ == "__main__":
    input_size = 16
    hidden_size = 20
    output_size = 8
    num_layers = 4
    batch = 300            # not a multiple of the tile -> exercises the ragged last block

    key = jax.random.PRNGKey(0)
    key, kx = jax.random.split(key)
    x = jax.random.normal(kx, (batch, input_size), jnp.float32)
    params = init_params(key, input_size, hidden_size, output_size, num_layers)
    packed = pack_params(params)           # packed once, reused for every forward call

    # Default tiling here: tb=256 -> 2 grid steps (so v7x's 2 TCs both get work),
    # last block ragged (rows 256..299), sub-slab register blocking inside.
    out = generative_ffnn_forward(x, packed)
    out = jax.block_until_ready(out)

    ref = reference_forward(x, params)
    assert out.shape == (batch, output_size)
    assert jnp.allclose(out, ref, atol=5e-5, rtol=5e-5), "mismatch vs reference"
    assert jnp.allclose(jnp.sum(out, axis=1), 1.0, atol=1e-4), "softmax rows must sum to 1"

    print("KERNEL_OK")
</pallas_src>

<mosaic_0001>
module attributes {stable_mosaic.version = 11 : i64} {
  func.func @ffnn_kernel(%arg0: i32, %arg1: memref<256x16xf32, #tpu.memory_space<vmem>>, %arg2: memref<5x20x20xf32, #tpu.memory_space<vmem>>, %arg3: memref<5x20x1xf32, #tpu.memory_space<vmem>>, %arg4: memref<256x8xf32, #tpu.memory_space<vmem>>) attributes {dimension_semantics = [#tpu.dimension_semantics<parallel>], iteration_bounds = array<i64: 2>, scalar_prefetch = 0 : i64, scratch_operands = 0 : i64, tpu.core_type = #tpu.core_type<tc>, window_params = [{transform_indices = @transform_0, window_bounds = array<i64: 256, 16>}, {pipeline_mode = #tpu.pipeline_mode<synchronous>, transform_indices = @transform_1, window_bounds = array<i64: 5, 20, 20>}, {pipeline_mode = #tpu.pipeline_mode<synchronous>, transform_indices = @transform_2, window_bounds = array<i64: 5, 20, 1>}, {transform_indices = @transform_3, window_bounds = array<i64: 256, 8>}]} {
    %c0_i32 = arith.constant 0 : i32
    %c256_i32 = arith.constant 256 : i32
    %0 = arith.muli %c0_i32, %c256_i32 : i32
    %1 = tpu.assume_multiple %0, 256 : i32
    %2 = arith.index_cast %1 : i32 to index
    %c0 = arith.constant 0 : index
    %3 = vector.load %arg1[%2, %c0] : memref<256x16xf32, #tpu.memory_space<vmem>>, vector<256x16xf32>
    %c0_0 = arith.constant 0 : index
    %c0_1 = arith.constant 0 : index
    %c0_2 = arith.constant 0 : index
    %4 = vector.load %arg2[%c0_0, %c0_1, %c0_2] : memref<5x20x20xf32, #tpu.memory_space<vmem>>, vector<1x20x16xf32>
    %5 = vector.shape_cast %4 : vector<1x20x16xf32> to vector<20x16xf32>
    %cst = arith.constant dense<0.000000e+00> : vector<20x256xf32>
    %6 = tpu.matmul %5, %3, %cst {dimension_numbers = #tpu.dot_dimension_numbers<[1], [1], [0], [0], [0, 0, 1, 0], [], []>} : vector<20x16xf32>, vector<256x16xf32>, vector<20x256xf32> -> vector<20x256xf32>
    %c0_3 = arith.constant 0 : index
    %c0_4 = arith.constant 0 : index
    %c0_5 = arith.constant 0 : index
    %7 = vector.load %arg3[%c0_3, %c0_4, %c0_5] : memref<5x20x1xf32, #tpu.memory_space<vmem>>, vector<1x20x1xf32>
    %8 = vector.shape_cast %7 : vector<1x20x1xf32> to vector<20x1xf32>
    %9 = vector.broadcast %8 : vector<20x1xf32> to vector<20x256xf32>
    %10 = arith.addf %6, %9 : vector<20x256xf32>
    %cst_6 = arith.constant 0.000000e+00 : f32
    %11 = vector.broadcast %cst_6 : f32 to vector<20x256xf32>
    %12 = arith.maximumf %10, %11 : vector<20x256xf32>
    %c1 = arith.constant 1 : index
    %c0_7 = arith.constant 0 : index
    %c0_8 = arith.constant 0 : index
    %13 = vector.load %arg2[%c1, %c0_7, %c0_8] : memref<5x20x20xf32, #tpu.memory_space<vmem>>, vector<1x20x20xf32>
    %14 = vector.shape_cast %13 : vector<1x20x20xf32> to vector<20x20xf32>
    %cst_9 = arith.constant dense<0.000000e+00> : vector<20x256xf32>
    %15 = tpu.matmul %14, %12, %cst_9 {dimension_numbers = #tpu.dot_dimension_numbers<[1], [0], [0], [1], [0, 0, 1, 1], [], []>} : vector<20x20xf32>, vector<20x256xf32>, vector<20x256xf32> -> vector<20x256xf32>
    %c1_10 = arith.constant 1 : index
    %c0_11 = arith.constant 0 : index
    %c0_12 = arith.constant 0 : index
    %16 = vector.load %arg3[%c1_10, %c0_11, %c0_12] : memref<5x20x1xf32, #tpu.memory_space<vmem>>, vector<1x20x1xf32>
    %17 = vector.shape_cast %16 : vector<1x20x1xf32> to vector<20x1xf32>
    %18 = vector.broadcast %17 : vector<20x1xf32> to vector<20x256xf32>
    %19 = arith.addf %15, %18 : vector<20x256xf32>
    %cst_13 = arith.constant 0.000000e+00 : f32
    %20 = vector.broadcast %cst_13 : f32 to vector<20x256xf32>
    %21 = arith.maximumf %19, %20 : vector<20x256xf32>
    %c2 = arith.constant 2 : index
    %c0_14 = arith.constant 0 : index
    %c0_15 = arith.constant 0 : index
    %22 = vector.load %arg2[%c2, %c0_14, %c0_15] : memref<5x20x20xf32, #tpu.memory_space<vmem>>, vector<1x20x20xf32>
    %23 = vector.shape_cast %22 : vector<1x20x20xf32> to vector<20x20xf32>
    %cst_16 = arith.constant dense<0.000000e+00> : vector<20x256xf32>
    %24 = tpu.matmul %23, %21, %cst_16 {dimension_numbers = #tpu.dot_dimension_numbers<[1], [0], [0], [1], [0, 0, 1, 1], [], []>} : vector<20x20xf32>, vector<20x256xf32>, vector<20x256xf32> -> vector<20x256xf32>
    %c2_17 = arith.constant 2 : index
    %c0_18 = arith.constant 0 : index
    %c0_19 = arith.constant 0 : index
    %25 = vector.load %arg3[%c2_17, %c0_18, %c0_19] : memref<5x20x1xf32, #tpu.memory_space<vmem>>, vector<1x20x1xf32>
    %26 = vector.shape_cast %25 : vector<1x20x1xf32> to vector<20x1xf32>
    %27 = vector.broadcast %26 : vector<20x1xf32> to vector<20x256xf32>
    %28 = arith.addf %24, %27 : vector<20x256xf32>
    %cst_20 = arith.constant 0.000000e+00 : f32
    %29 = vector.broadcast %cst_20 : f32 to vector<20x256xf32>
    %30 = arith.maximumf %28, %29 : vector<20x256xf32>
    %c3 = arith.constant 3 : index
    %c0_21 = arith.constant 0 : index
    %c0_22 = arith.constant 0 : index
    %31 = vector.load %arg2[%c3, %c0_21, %c0_22] : memref<5x20x20xf32, #tpu.memory_space<vmem>>, vector<1x20x20xf32>
    %32 = vector.shape_cast %31 : vector<1x20x20xf32> to vector<20x20xf32>
    %cst_23 = arith.constant dense<0.000000e+00> : vector<20x256xf32>
    %33 = tpu.matmul %32, %30, %cst_23 {dimension_numbers = #tpu.dot_dimension_numbers<[1], [0], [0], [1], [0, 0, 1, 1], [], []>} : vector<20x20xf32>, vector<20x256xf32>, vector<20x256xf32> -> vector<20x256xf32>
    %c3_24 = arith.constant 3 : index
    %c0_25 = arith.constant 0 : index
    %c0_26 = arith.constant 0 : index
    %34 = vector.load %arg3[%c3_24, %c0_25, %c0_26] : memref<5x20x1xf32, #tpu.memory_space<vmem>>, vector<1x20x1xf32>
    %35 = vector.shape_cast %34 : vector<1x20x1xf32> to vector<20x1xf32>
    %36 = vector.broadcast %35 : vector<20x1xf32> to vector<20x256xf32>
    %37 = arith.addf %33, %36 : vector<20x256xf32>
    %cst_27 = arith.constant 0.000000e+00 : f32
    %38 = vector.broadcast %cst_27 : f32 to vector<20x256xf32>
    %39 = arith.maximumf %37, %38 : vector<20x256xf32>
    %c4 = arith.constant 4 : index
    %c0_28 = arith.constant 0 : index
    %c0_29 = arith.constant 0 : index
    %40 = vector.load %arg2[%c4, %c0_28, %c0_29] : memref<5x20x20xf32, #tpu.memory_space<vmem>>, vector<1x8x20xf32>
    %41 = vector.shape_cast %40 : vector<1x8x20xf32> to vector<8x20xf32>
    %c4_30 = arith.constant 4 : index
    %c0_31 = arith.constant 0 : index
    %c0_32 = arith.constant 0 : index
    %42 = vector.load %arg3[%c4_30, %c0_31, %c0_32] : memref<5x20x1xf32, #tpu.memory_space<vmem>>, vector<1x8x1xf32>
    %43 = vector.shape_cast %42 : vector<1x8x1xf32> to vector<8x1xf32>
    %cst_33 = arith.constant dense<0.000000e+00> : vector<8x256xf32>
    %44 = tpu.matmul %41, %39, %cst_33 {dimension_numbers = #tpu.dot_dimension_numbers<[1], [0], [0], [1], [0, 0, 1, 1], [], []>} : vector<8x20xf32>, vector<20x256xf32>, vector<8x256xf32> -> vector<8x256xf32>
    %45 = vector.broadcast %43 : vector<8x1xf32> to vector<8x256xf32>
    %46 = arith.addf %44, %45 : vector<8x256xf32>
    %cst_34 = arith.constant dense<0xFF800000> : vector<256xf32>
    %47 = vector.multi_reduction <maximumf>, %46, %cst_34 [0] : vector<8x256xf32> to vector<256xf32>
    %48 = vector.shape_cast %47 : vector<256xf32> to vector<1x256xf32>
    %49 = vector.broadcast %48 : vector<1x256xf32> to vector<8x256xf32>
    %50 = arith.subf %46, %49 : vector<8x256xf32>
    %51 = math.exp %50 : vector<8x256xf32>
    %cst_35 = arith.constant dense<0.000000e+00> : vector<256xf32>
    %52 = vector.multi_reduction <add>, %51, %cst_35 [0] : vector<8x256xf32> to vector<256xf32>
    %53 = vector.shape_cast %52 : vector<256xf32> to vector<1x256xf32>
    %54 = tpu.reciprocal %53 {approx = true} : vector<1x256xf32> -> vector<1x256xf32>
    %55 = arith.mulf %53, %54 : vector<1x256xf32>
    %cst_36 = arith.constant 2.000000e+00 : f32
    %56 = vector.broadcast %cst_36 : f32 to vector<1x256xf32>
    %57 = arith.subf %56, %55 : vector<1x256xf32>
    %58 = arith.mulf %54, %57 : vector<1x256xf32>
    %59 = vector.broadcast %58 : vector<1x256xf32> to vector<8x256xf32>
    %60 = arith.mulf %51, %59 : vector<8x256xf32>
    %61 = tpu.transpose %60, [1, 0] : vector<8x256xf32> -> vector<256x8xf32>
    %62 = arith.index_cast %1 : i32 to index
    %c0_37 = arith.constant 0 : index
    %63 = vector.load %arg4[%62, %c0_37] : memref<256x8xf32, #tpu.memory_space<vmem>>, vector<256x8xf32>
    tpu.vector_store %arg4[%62, %c0_37], %61 {strides = array<i32>} : memref<256x8xf32, #tpu.memory_space<vmem>>, vector<256x8xf32>,
    %c1_i32 = arith.constant 1 : i32
    return
  }
  func.func @transform_0(%arg0: i32) -> (i32, i32) {
    %c0_i32 = arith.constant 0 : i32
    %c0_i32_0 = arith.constant 0 : i32
    return %arg0, %c0_i32 : i32, i32
  }
  func.func @transform_1(%arg0: i32) -> (i32, i32, i32) {
    %c0_i32 = arith.constant 0 : i32
    %c0_i32_0 = arith.constant 0 : i32
    %c0_i32_1 = arith.constant 0 : i32
    %c0_i32_2 = arith.constant 0 : i32
    return %c0_i32, %c0_i32_0, %c0_i32_1 : i32, i32, i32
  }
  func.func @transform_2(%arg0: i32) -> (i32, i32, i32) {
    %c0_i32 = arith.constant 0 : i32
    %c0_i32_0 = arith.constant 0 : i32
    %c0_i32_1 = arith.constant 0 : i32
    %c0_i32_2 = arith.constant 0 : i32
    return %c0_i32, %c0_i32_0, %c0_i32_1 : i32, i32, i32
  }
  func.func @transform_3(%arg0: i32) -> (i32, i32) {
    %c0_i32 = arith.constant 0 : i32
    %c0_i32_0 = arith.constant 0 : i32
    return %arg0, %c0_i32 : i32, i32
  }
}

</mosaic_0001>

<bundles_post_ra>
// kernel: tpu_custom_call.1
= control target key start
LH: loop header
LB: loop body
LE: loop exit
PB: predicated region body
PF: predicated region fallthrough
CT: control target
= control target key end

     0   :  { %s1557_s12 = smov 0   ;;  %s1559_s13 = smov 0   ;;  %s1981_s0 = inlined_call_operand.vmem [shape: f32[300,16], index: 0, kind: input, shape index: {}]   ;;  %s1982_s1 = inlined_call_operand.vmem [shape: f32[5,20,20], index: 1, kind: input, shape index: {}]   ;;  %s1983_s2 = inlined_call_operand.vmem [shape: f32[5,20,1], index: 2, kind: input, shape index: {}]   ;;  %s1984_s3 = inlined_call_operand.vmem [shape: f32[300,8], index: 3, kind: output, shape index: {}]  }
   0x1   :  { %s1561_s14 = smov 0  }
   0x2 LB: > { %s1570_s15 = sadd.s32 4294967295, %s1502_s14   ;;  %s1572_s16 = sadd.s32 1, %s1502_s14   ;;  %s1502_s14 = sphi %s1561_s14, %s1993_s14   ;;  %s1498_s13 = sphi %s1559_s13, %s1992_s13   ;;  %s1494_s12 = sphi %s1557_s12, %s1991_s12  }
   0x3   : > { %s85_s17 = ssub.s32 %s1502_s14, %s1572_s16  ;;  %s88_s18 = sadd.s32 1, %s1498_s13 }
   0x4   : > { %p86_p0 = scmp.eq.s32.totalorder %s85_s17, 0  ;;  %p98_p1 = scmp.ne.s32.totalorder %s1498_s13, %s1494_s12 }
   0x5   : > { %p99_p2 = scmp.eq.s32.totalorder %s1570_s15, 1  ;;  %p1237_p3 = scmp.ge.s32.totalorder %s1502_s14, 1 }
   0x6   : > { %s1580_s19 = scalar_select %p86_p0, %s1498_s13, %s88_s18  }
   0x7   : > { %p1582_p4 = por %p99_p2, %p98_p1  ;;  %p146_p5 = scmp.lt.s32.totalorder %s1502_s14, 3 }
   0x9   : > { %p147_p6 = pnand %p1237_p3, %p146_p5 }
   0xa   : > { %s1587_s21 = sshll.u32 (!%p147_p6), %s1570_s15, 5  ;;  %s170_s14 = sand.u32 (!%p147_p6), 1, %s1494_s12  }
   0xb   : > { %150 = sbr.rel (%p147_p6) target bundleno = 1240 (0x4d8), region = 32  ;;  %p178_p7 = scmp.lt.s32.totalorder (!%p147_p6), %s1587_s21, 37 }
   0xc   : > { %s1238_s17 = sshll.u32 (!%p147_p6), %s170_s14, 8 }
   0xd   : > { %s1773_s18 = scalar_lea.vmem (!%p147_p6), [#allocation2], %s1238_s17  }
  0x10   : > { %s179_s22 = scalar_select %p178_p7, %s1587_s21, 37  ;;  %vm245_vm0 = vcmask 130048   ;;  %v229_v10 = vld [vmem:[%s1983_s2 + $0x10] sm:$0xf]  ;;  %v1536_v13 = vmov 0   ;;  %v228_v16 = vld [vmem:[%s1983_s2 + $0x8] sm:$0xff] }
  0x11   : > { %1437 = vset.pattern.permute.xlu0 %v1536_v13  ;;  %1438 = vset.pattern.permute.xlu1 %v1536_v13  ;;  %v1298_v21 = vld [vmem:[%s1983_s2 + $0x40] sm:$0xf]  ;;  %v1312_v27 = vld [vmem:[%s1983_s2 + $0x58] sm:$0xf]  ;;  %v1284_v28 = vld [vmem:[%s1983_s2 + $0x28] sm:$0xf] }
  0x12   : > { %s1240_s23 = sshll.u32 %s179_s22, 3  ;;  %242 = vperm.xlu0 %1437, %v229_v10   ;;  %1439 = vset.pattern.permute.xlu2 %v1536_v13  ;;  %v227_v22 = vld [vmem:[%s1983_s2] sm:$0xff]  ;;  %v1297_v34 = vld [vmem:[%s1983_s2 + $0x38] sm:$0xff]  ;;  %v1311_v39 = vld [vmem:[%s1983_s2 + $0x50] sm:$0xff]  ;;  %vm442_vm1 = vcmask 1043456   ;;  %vm432_vm2 = vcmask 162816  }
  0x13   : > { %s1594_s26 = scalar_lea.vmem %s1981_s0, %s1240_s23  ;;  %232 = vperm.xlu1 %1438, %v227_v22   ;;  %v1322_v33 = vld [vmem:[%s1983_s2 + $0x60] sm:$0xff]  ;;  %v225_v43 = vld [vmem:[%s1982_s1 + $0x8] sm:$0xff]  ;;  %v226_v44 = vld [vmem:[%s1982_s1 + $0x10] sm:$0xf]  ;;  %vm861_vm3 = vcmask 64512   ;;  %s902_s12 = ssub.s32 (%p1582_p4), 38, %s1587_s21 }
  0x14   : > { %v207_v0 = vld [vmem:[%s1594_s26 + $0x78] sm:$0xff]  ;;  %v206_v2 = vld [vmem:[%s1594_s26 + $0x70] sm:$0xff]  ;;  %v205_v4 = vld [vmem:[%s1594_s26 + $0x68] sm:$0xff]  ;;  %s1344_s22 = sshll.u32 (%p1582_p4), %s1570_s15, 8  ;;  %p903_p8 = scmp.lt.s32.totalorder (%p1582_p4), %s902_s12, 32 }
  0x15   : > { %v223_v1 = vld [vmem:[%s1594_s26 + $0xf8] sm:$0xff]  ;;  %1241 = vmatpush.xpose.msk.msra.mxu0 %vm245_vm0, %v207_v0  ;;  %v222_v3 = vld [vmem:[%s1594_s26 + $0xf0] sm:$0xff]  ;;  %v221_v5 = vld [vmem:[%s1594_s26 + $0xe8] sm:$0xff]  ;;  %s1846_s25 = scalar_lea.vmem (%p1582_p4), %s1984_s3, %s1344_s22  }
  0x16   : > { %1260 = vmatpush.xpose.msk.msra.mxu1 %vm245_vm0, %v223_v1  ;;  %v204_v6 = vld [vmem:[%s1594_s26 + $0x60] sm:$0xff]  ;;  %v203_v8 = vld [vmem:[%s1594_s26 + $0x58] sm:$0xff]  ;;  %v202_v11 = vld [vmem:[%s1594_s26 + $0x50] sm:$0xff] }
  0x17   : > { %v220_v7 = vld [vmem:[%s1594_s26 + $0xe0] sm:$0xff]  ;;  %v219_v9 = vld [vmem:[%s1594_s26 + $0xd8] sm:$0xff]  ;;  %v218_v12 = vld [vmem:[%s1594_s26 + $0xd0] sm:$0xff] }
  0x18   : > { %v201_v14 = vld [vmem:[%s1594_s26 + $0x48] sm:$0xff]  ;;  %v200_v17 = vld [vmem:[%s1594_s26 + $0x40] sm:$0xff]  ;;  %v199_v19 = vld [vmem:[%s1594_s26 + $0x38] sm:$0xff] }
  0x19   : > { %1242 = vmatpush.xpose.msk.msra.mxu0 %vm245_vm0, %v206_v2  ;;  %v217_v15 = vld [vmem:[%s1594_s26 + $0xc8] sm:$0xff]  ;;  %v216_v18 = vld [vmem:[%s1594_s26 + $0xc0] sm:$0xff]  ;;  %v215_v20 = vld [vmem:[%s1594_s26 + $0xb8] sm:$0xff] }
  0x1a   : > { %1261 = vmatpush.xpose.msk.msra.mxu1 %vm245_vm0, %v222_v3  ;;  %237 = vperm.xlu0 %1437, %v228_v16   ;;  %v198_v23 = vld [vmem:[%s1594_s26 + $0x30] sm:$0xff]  ;;  %v197_v25 = vld [vmem:[%s1594_s26 + $0x28] sm:$0xff]  ;;  %v196_v29 = vld [vmem:[%s1594_s26 + $0x20] sm:$0xff] }
  0x1b   : > { %v214_v24 = vld [vmem:[%s1594_s26 + $0xb0] sm:$0xff]  ;;  %v213_v26 = vld [vmem:[%s1594_s26 + $0xa8] sm:$0xff]  ;;  %v212_v30 = vld [vmem:[%s1594_s26 + $0xa0] sm:$0xff]  ;;  %429 = vperm.xlu1 %1438, %v1284_v28  }
  0x1c   : > { %v195_v31 = vld [vmem:[%s1594_s26 + $0x18] sm:$0xff]  ;;  %v194_v35 = vld [vmem:[%s1594_s26 + $0x10] sm:$0xff]  ;;  %v193_v37 = vld [vmem:[%s1594_s26 + $0x8] sm:$0xff] }
  0x1d   : > { %1243 = vmatpush.xpose.msk.msra.mxu0 %vm245_vm0, %v205_v4  ;;  %v211_v32 = vld [vmem:[%s1594_s26 + $0x98] sm:$0xff]  ;;  %v210_v36 = vld [vmem:[%s1594_s26 + $0x90] sm:$0xff]  ;;  %v209_v38 = vld [vmem:[%s1594_s26 + $0x88] sm:$0xff] }
  0x1e   : > { %1262 = vmatpush.xpose.msk.msra.mxu1 %vm245_vm0, %v221_v5  ;;  %v192_v40 = vld [vmem:[%s1594_s26] sm:$0xff]  ;;  %v1282_v54 = vld [vmem:[%s1983_s2 + $0x18] sm:$0xff]  ;;  %v1296_v5 = vld [vmem:[%s1983_s2 + $0x30] sm:$0xff] }
  0x1f   : > { %v208_v41 = vld [vmem:[%s1594_s26 + $0x80] sm:$0xff]  ;;  %v1279_v4 = vld [vmem:[%s1982_s1 + $0x18] sm:$0xff] }
  0x20   : > { %v224_v42 = vld [vmem:[%s1982_s1] sm:$0xff] }
  0x21   : > { %1244 = vmatpush.xpose.msk.msra.mxu0 %vm245_vm0, %v204_v6  ;;  %v1283_v50 = vld [vmem:[%s1983_s2 + $0x20] sm:$0xff] }
  0x22   : > { %1263 = vmatpush.xpose.msk.msra.mxu1 %vm245_vm0, %v220_v7  ;;  %527 = vperm.xlu0 %1437, %v1298_v21   ;;  %v1280_v6 = vld [vmem:[%s1982_s1 + $0x20] sm:$0xff]  ;;  %v1310_v7 = vld [vmem:[%s1983_s2 + $0x48] sm:$0xff] }
  0x23   : > { %522 = vperm.xlu1 %1438, %v1297_v34   ;;  %424 = vperm.xlu2 %1439, %v1283_v50  }
  0x25   : > { %1245 = vmatpush.xpose.msk.msra.mxu0 %vm245_vm0, %v203_v8  ;;  %v1281_v8 = vld [vmem:[%s1982_s1 + $0x28] sm:$0xf] }
  0x26   : > { %1264 = vmatpush.xpose.msk.msra.mxu1 %vm245_vm0, %v219_v9 }
  0x29   : > { %1246 = vmatpush.xpose.msk.msra.mxu0 %vm245_vm0, %v202_v11 }
  0x2a   : > { %1265 = vmatpush.xpose.msk.msra.mxu1 %vm245_vm0, %v218_v12  ;;  %623 = vperm.xlu0 %1437, %v1312_v27  }
  0x2b   : > { %618 = vperm.xlu1 %1438, %v1311_v39   ;;  %419 = vperm.xlu2 %1439, %v1282_v54   ;;  %v1307_v54 = vld [vmem:[%s1982_s1 + $0x48] sm:$0xff] }
  0x2d   : > { %1247 = vmatpush.xpose.msk.msra.mxu0 %vm245_vm0, %v201_v14 }
  0x2e   : > { %1266 = vmatpush.xpose.msk.msra.mxu1 %vm245_vm0, %v217_v15 }
  0x31   : > { %1248 = vmatpush.xpose.msk.msra.mxu0 %vm245_vm0, %v200_v17 }
  0x32   : > { %1267 = vmatpush.xpose.msk.msra.mxu1 %vm245_vm0, %v216_v18  ;;  %705 = vperm.xlu0 %1437, %v1322_v33  }
  0x33   : > { %517 = vperm.xlu2 %1439, %v1296_v5  }
  0x35   : > { %1249 = vmatpush.xpose.msk.msra.mxu0 %vm245_vm0, %v199_v19 }
  0x36   : > { %1268 = vmatpush.xpose.msk.msra.mxu1 %vm245_vm0, %v215_v20 }
  0x39   : > { %1250 = vmatpush.xpose.msk.msra.mxu0 %vm245_vm0, %v198_v23 }
  0x3a   : > { %1269 = vmatpush.xpose.msk.msra.mxu1 %vm245_vm0, %v214_v24 }
  0x3b   : > { %613 = vperm.xlu2 %1439, %v1310_v7  }
  0x3d   : > { %1251 = vmatpush.xpose.msk.msra.mxu0 %vm245_vm0, %v197_v25 }
  0x3e   : > { %1270 = vmatpush.xpose.msk.msra.mxu1 %vm245_vm0, %v213_v26 }
  0x41   : > { %1252 = vmatpush.xpose.msk.msra.mxu0 %vm245_vm0, %v196_v29 }
  0x42   : > { %1271 = vmatpush.xpose.msk.msra.mxu1 %vm245_vm0, %v212_v30  ;;  %v1293_v30 = vld [vmem:[%s1982_s1 + $0x30] sm:$0xff] }
  0x45   : > { %1253 = vmatpush.xpose.msk.msra.mxu0 %vm245_vm0, %v195_v31  ;;  %v1294_v31 = vld [vmem:[%s1982_s1 + $0x38] sm:$0xff] }
  0x46   : > { %1272 = vmatpush.xpose.msk.msra.mxu1 %vm245_vm0, %v211_v32  ;;  %v1295_v32 = vld [vmem:[%s1982_s1 + $0x40] sm:$0xf] }
  0x49   : > { %1254 = vmatpush.xpose.msk.msra.mxu0 %vm245_vm0, %v194_v35 }
  0x4a   : > { %1273 = vmatpush.xpose.msk.msra.mxu1 %vm245_vm0, %v210_v36 }
  0x4d   : > { %1255 = vmatpush.xpose.msk.msra.mxu0 %vm245_vm0, %v193_v37 }
  0x4e   : > { %1274 = vmatpush.xpose.msk.msra.mxu1 %vm245_vm0, %v209_v38 }
  0x51   : > { %1256 = vmatpush.xpose.msk.msra.mxu0 %vm245_vm0, %v192_v40 }
  0x52   : > { %1275 = vmatpush.xpose.msk.msra.mxu1 %vm245_vm0, %v208_v41 }
  0x54   : > { %1257 = vmatmul.msk.f32.vlgmr.msra.gmra.mxu0 %vm245_vm0, %v224_v42 }
  0x55   : > { %1276 = vmatmul.msk.f32.vlgmr.msra.gmra.mxu1 %vm245_vm0, %v224_v42 }
  0x5c   : > { %1258 = vmatmul.msk.f32.gmra.mxu0 %vm245_vm0, %v225_v43 }
  0x5d   : > { %1277 = vmatmul.msk.f32.gmra.mxu1 %vm245_vm0, %v225_v43 }
  0x64   : > { %1259 = vmatmul.msk.f32.gmra.mxu0 %vm245_vm0, %v226_v44 }
  0x65   : > { %1278 = vmatmul.msk.f32.gmra.mxu1 %vm245_vm0, %v226_v44 }
  0x7d   : > { %v425_v11 = vpop.permute.xlu2 %424 }
  0x84   : > { %v243_v47 = vpop.permute.xlu0 %242 }
  0x85   : > { %v233_v59 = vpop.permute.xlu1 %232  ;;  %v420_v21 = vpop.permute.xlu2 %419 }
  0x8c   : > { %v238_v51 = vpop.permute.xlu0 %237 }
  0x8d   : > { %v430_v14 = vpop.permute.xlu1 %429 }
  0x94   : > { %v528_v37 = vpop.permute.xlu0 %527 }
  0x95   : > { %v523_v38 = vpop.permute.xlu1 %522 }
  0xd1   : > { %v368_v45 = vpop.f32.mrf.mxu0 }
  0xd2   : > { %v394_v46 = vpop.f32.mrf.mxu1  ;;  %v369_v60 = vadd.f32 %v368_v45, %v233_v59  ;;  %v518_v45 = vpop.permute.xlu2 %517 }
  0xd3   : > { %v395_v61 = vadd.f32 %v394_v46, %v233_v59 }
  0xd4   : > { %v403_v2 = vmax.f32 %v369_v60, 0.0 }
  0xd5   : > { %v404_v3 = vmax.f32 %v395_v61, 0.0  ;;  %v624_v61 = vpop.permute.xlu0 %623 }
  0xd9   : > { %v371_v48 = vpop.f32.mrf.mxu0 }
  0xda   : > { %v397_v49 = vpop.f32.mrf.mxu1  ;;  %v372_v55 = vadd.f32 %v371_v48, %v238_v51  ;;  %v614_v5 = vpop.permute.xlu2 %613 }
  0xdb   : > { %v398_v56 = vadd.f32 %v397_v49, %v238_v51 }
  0xdc   : > { %v405_v0 = vmax.f32 %v372_v55, 0.0  ;;  %v1308_v55 = vld [vmem:[%s1982_s1 + $0x50] sm:$0xff] }
  0xdd   : > { %v406_v1 = vmax.f32 %v398_v56, 0.0  ;;  %v1309_v56 = vld [vmem:[%s1982_s1 + $0x58] sm:$0xf] }
  0xe1   : > { %v374_v52 = vpop.f32.mrf.mxu0 }
  0xe2   : > { %v400_v53 = vpop.f32.mrf.mxu1  ;;  %v375_v57 = vadd.f32 %v374_v52, %v243_v47 }
  0xe3   : > { %v401_v58 = vadd.f32 %v400_v53, %v243_v47 }
  0xe4   : > { %v407_v62 = vmax.f32 %v375_v57, 0.0 }
  0xe5   : > { %v408_v63 = vmax.f32 %v401_v58, 0.0 }
  0xe6   : > { %1285 = vmatpush.msk.msra.mxu2 %vm442_vm1, %v407_v62  ;;  %v619_v62 = vpop.permute.xlu1 %618 }
  0xe7   : > { %1289 = vmatpush.msk.msra.mxu3 %vm442_vm1, %v408_v63 }
  0xe8   : > { %463 = vmatpush.msra.mxu2 %v405_v0 }
  0xe9   : > { %489 = vmatpush.msra.mxu3 %v406_v1 }
  0xea   : > { %464 = vmatpush.msra.mxu2 %v403_v2 }
  0xeb   : > { %490 = vmatpush.msra.mxu3 %v404_v3  ;;  %1286 = vmatmul.msk.f32.vlgmr.msra.gmra.mxu2 %vm432_vm2, %v1279_v4 }
  0xec   : > { %1290 = vmatmul.msk.f32.vlgmr.msra.gmra.mxu3 %vm432_vm2, %v1279_v4 }
  0xf3   : > { %1287 = vmatmul.msk.f32.gmra.mxu2 %vm432_vm2, %v1280_v6 }
  0xf4   : > { %1291 = vmatmul.msk.f32.gmra.mxu3 %vm432_vm2, %v1280_v6 }
  0xfb   : > { %1288 = vmatmul.msk.f32.gmra.mxu2 %vm432_vm2, %v1281_v8 }
  0xfc   : > { %1292 = vmatmul.msk.f32.gmra.mxu3 %vm432_vm2, %v1281_v8 }
 0x16e   : > { %v466_v9 = vpop.f32.mrf.mxu2 }
 0x16f   : > { %v492_v10 = vpop.f32.mrf.mxu3  ;;  %v467_v22 = vadd.f32 %v466_v9, %v420_v21 }
 0x170   : > { %v493_v23 = vadd.f32 %v492_v10, %v420_v21 }
 0x171   : > { %v501_v28 = vmax.f32 %v467_v22, 0.0 }
 0x172   : > { %v502_v29 = vmax.f32 %v493_v23, 0.0 }
 0x176   : > { %v469_v12 = vpop.f32.mrf.mxu2 }
 0x177   : > { %v495_v13 = vpop.f32.mrf.mxu3  ;;  %v470_v17 = vadd.f32 %v469_v12, %v425_v11 }
 0x178   : > { %v496_v18 = vadd.f32 %v495_v13, %v425_v11 }
 0x179   : > { %v503_v26 = vmax.f32 %v470_v17, 0.0 }
 0x17a   : > { %v504_v27 = vmax.f32 %v496_v18, 0.0 }
 0x17e   : > { %v472_v15 = vpop.f32.mrf.mxu2 }
 0x17f   : > { %v498_v16 = vpop.f32.mrf.mxu3  ;;  %v473_v19 = vadd.f32 %v472_v15, %v430_v14  ;;  %v706_v15 = vpop.permute.xlu0 %705 }
 0x180   : > { %v499_v20 = vadd.f32 %v498_v16, %v430_v14  ;;  %v1321_v14 = vld [vmem:[%s1982_s1 + $0x60] sm:$0xff] }
 0x181   : > { %v505_v24 = vmax.f32 %v473_v19, 0.0 }
 0x182   : > { %v506_v25 = vmax.f32 %v499_v20, 0.0 }
 0x183   : > { %1299 = vmatpush.msk.msrb.mxu2 %vm442_vm1, %v505_v24 }
 0x184   : > { %1303 = vmatpush.msk.msrb.mxu3 %vm442_vm1, %v506_v25 }
 0x185   : > { %559 = vmatpush.msrb.mxu2 %v503_v26 }
 0x186   : > { %585 = vmatpush.msrb.mxu3 %v504_v27 }
 0x187   : > { %560 = vmatpush.msrb.mxu2 %v501_v28 }
 0x188   : > { %586 = vmatpush.msrb.mxu3 %v502_v29  ;;  %1300 = vmatmul.msk.f32.vlgmr.msrb.gmra.mxu2 %vm432_vm2, %v1293_v30 }
 0x189   : > { %1304 = vmatmul.msk.f32.vlgmr.msrb.gmra.mxu3 %vm432_vm2, %v1293_v30 }
 0x190   : > { %1301 = vmatmul.msk.f32.gmra.mxu2 %vm432_vm2, %v1294_v31 }
 0x191   : > { %1305 = vmatmul.msk.f32.gmra.mxu3 %vm432_vm2, %v1294_v31 }
 0x198   : > { %1302 = vmatmul.msk.f32.gmra.mxu2 %vm432_vm2, %v1295_v32 }
 0x199   : > { %1306 = vmatmul.msk.f32.gmra.mxu3 %vm432_vm2, %v1295_v32 }
 0x20b   : > { %v562_v33 = vpop.f32.mrf.mxu2 }
 0x20c   : > { %v588_v34 = vpop.f32.mrf.mxu3  ;;  %v563_v46 = vadd.f32 %v562_v33, %v518_v45 }
 0x20d   : > { %v589_v47 = vadd.f32 %v588_v34, %v518_v45 }
 0x20e   : > { %v597_v52 = vmax.f32 %v563_v46, 0.0 }
 0x20f   : > { %v598_v53 = vmax.f32 %v589_v47, 0.0 }
 0x213   : > { %v565_v35 = vpop.f32.mrf.mxu2 }
 0x214   : > { %v591_v36 = vpop.f32.mrf.mxu3  ;;  %v566_v41 = vadd.f32 %v565_v35, %v523_v38 }
 0x215   : > { %v592_v42 = vadd.f32 %v591_v36, %v523_v38 }
 0x216   : > { %v599_v50 = vmax.f32 %v566_v41, 0.0 }
 0x217   : > { %v600_v51 = vmax.f32 %v592_v42, 0.0 }
 0x21b   : > { %v568_v39 = vpop.f32.mrf.mxu2 }
 0x21c   : > { %v594_v40 = vpop.f32.mrf.mxu3  ;;  %v569_v43 = vadd.f32 %v568_v39, %v528_v37 }
 0x21d   : > { %v595_v44 = vadd.f32 %v594_v40, %v528_v37 }
 0x21e   : > { %v601_v48 = vmax.f32 %v569_v43, 0.0 }
 0x21f   : > { %v602_v49 = vmax.f32 %v595_v44, 0.0 }
 0x220   : > { %1313 = vmatpush.msk.msra.mxu2 %vm442_vm1, %v601_v48 }
 0x221   : > { %1317 = vmatpush.msk.msra.mxu3 %vm442_vm1, %v602_v49 }
 0x222   : > { %655 = vmatpush.msra.mxu2 %v599_v50 }
 0x223   : > { %681 = vmatpush.msra.mxu3 %v600_v51 }
 0x224   : > { %656 = vmatpush.msra.mxu2 %v597_v52 }
 0x225   : > { %682 = vmatpush.msra.mxu3 %v598_v53  ;;  %1314 = vmatmul.msk.f32.vlgmr.msra.gmra.mxu2 %vm432_vm2, %v1307_v54 }
 0x226   : > { %1318 = vmatmul.msk.f32.vlgmr.msra.gmra.mxu3 %vm432_vm2, %v1307_v54 }
 0x22d   : > { %1315 = vmatmul.msk.f32.gmra.mxu2 %vm432_vm2, %v1308_v55 }
 0x22e   : > { %1319 = vmatmul.msk.f32.gmra.mxu3 %vm432_vm2, %v1308_v55 }
 0x235   : > { %1316 = vmatmul.msk.f32.gmra.mxu2 %vm432_vm2, %v1309_v56 }
 0x236   : > { %1320 = vmatmul.msk.f32.gmra.mxu3 %vm432_vm2, %v1309_v56 }
 0x2a8   : > { %v658_v57 = vpop.f32.mrf.mxu2 }
 0x2a9   : > { %v684_v58 = vpop.f32.mrf.mxu3  ;;  %v659_v6 = vadd.f32 %v658_v57, %v614_v5 }
 0x2aa   : > { %v685_v7 = vadd.f32 %v684_v58, %v614_v5 }
 0x2ab   : > { %v693_v12 = vmax.f32 %v659_v6, 0.0 }
 0x2ac   : > { %v694_v13 = vmax.f32 %v685_v7, 0.0 }
 0x2b0   : > { %v661_v59 = vpop.f32.mrf.mxu2 }
 0x2b1   : > { %v687_v60 = vpop.f32.mrf.mxu3  ;;  %v662_v1 = vadd.f32 %v661_v59, %v619_v62 }
 0x2b2   : > { %v688_v2 = vadd.f32 %v687_v60, %v619_v62 }
 0x2b3   : > { %v695_v10 = vmax.f32 %v662_v1, 0.0 }
 0x2b4   : > { %v696_v11 = vmax.f32 %v688_v2, 0.0 }
 0x2b8   : > { %v664_v63 = vpop.f32.mrf.mxu2 }
 0x2b9   : > { %v690_v0 = vpop.f32.mrf.mxu3  ;;  %v665_v3 = vadd.f32 %v664_v63, %v624_v61 }
 0x2ba   : > { %v691_v4 = vadd.f32 %v690_v0, %v624_v61 }
 0x2bb   : > { %v697_v8 = vmax.f32 %v665_v3, 0.0 }
 0x2bc   : > { %v698_v9 = vmax.f32 %v691_v4, 0.0 }
 0x2bd   : > { %1323 = vmatpush.msk.msrb.mxu2 %vm442_vm1, %v697_v8 }
 0x2be   : > { %1325 = vmatpush.msk.msrb.mxu3 %vm442_vm1, %v698_v9 }
 0x2bf   : > { %731 = vmatpush.msrb.mxu2 %v695_v10 }
 0x2c0   : > { %751 = vmatpush.msrb.mxu3 %v696_v11 }
 0x2c1   : > { %732 = vmatpush.msrb.mxu2 %v693_v12 }
 0x2c2   : > { %752 = vmatpush.msrb.mxu3 %v694_v13  ;;  %1324 = vmatmul.msk.f32.vlgmr.msrb.gmra.mxu2 %vm432_vm2, %v1321_v14 }
 0x2c3   : > { %1326 = vmatmul.msk.f32.vlgmr.msrb.gmra.mxu3 %vm432_vm2, %v1321_v14 }
 0x345   : > { %v734_v16 = vpop.f32.mrf.mxu2 }
 0x346   : > { %v754_v17 = vpop.f32.mrf.mxu3  ;;  %v735_v18 = vadd.f32 %v734_v16, %v706_v15 }
 0x347   : > { %v755_v19 = vadd.f32 %v754_v17, %v706_v15 }
 0x348   : > { %v757_v20 = vrot.slane %v735_v18, 4 }
 0x349   : > { %v763_v21 = vrot.slane %v755_v19, 4 }
 0x34a   : > { %v758_v22 = vmax.f32 %v735_v18, %v757_v20 }
 0x34b   : > { %v764_v23 = vmax.f32 %v755_v19, %v763_v21 }
 0x34c   : > { %v759_v24 = vrot.slane %v758_v22, 2 }
 0x34d   : > { %v765_v25 = vrot.slane %v764_v23, 2 }
 0x34e   : > { %v760_v26 = vmax.f32 %v758_v22, %v759_v24 }
 0x34f   : > { %v766_v27 = vmax.f32 %v764_v23, %v765_v25 }
 0x350   : > { %v761_v28 = vrot.slane %v760_v26, 1 }
 0x351   : > { %v767_v29 = vrot.slane %v766_v27, 1 }
 0x352   : > { %v762_v30 = vmax.f32 %v760_v26, %v761_v28 }
 0x353   : > { %v768_v31 = vmax.f32 %v766_v27, %v767_v29 }
 0x354   : > { %v769_v32 = vsub.f32 %v735_v18, %v762_v30 }
 0x355   : > { %v770_v33 = vsub.f32 %v755_v19, %v768_v31 }
 0x356   : > { %v771_v34 = vmul.f32 1.442695, %v769_v32 }
 0x357   : > { %v773_v35 = vmul.f32 1.442695, %v770_v33 }
 0x358   : > { %1440 = vpow2.f32 %v771_v34 }
 0x359   : > { %1442 = vpow2.f32 %v773_v35 }
 0x35e   : > { %v1441_v36 = vpop.eup %1440 }
 0x35f   : > { %v1443_v37 = vpop.eup %1442  ;;  %v775_v38 = vrot.slane %v1441_v36, 4 }
 0x360   : > { %v781_v39 = vrot.slane %v1443_v37, 4 }
 0x361   : > { %v776_v40 = vadd.f32 %v1441_v36, %v775_v38 }
 0x362   : > { %v782_v41 = vadd.f32 %v1443_v37, %v781_v39 }
 0x363   : > { %v777_v42 = vrot.slane %v776_v40, 2 }
 0x364   : > { %v783_v43 = vrot.slane %v782_v41, 2 }
 0x365   : > { %v778_v44 = vadd.f32 %v777_v42, %v776_v40 }
 0x366   : > { %v784_v45 = vadd.f32 %v783_v43, %v782_v41 }
 0x367   : > { %v779_v46 = vrot.slane %v778_v44, 1 }
 0x368   : > { %v785_v47 = vrot.slane %v784_v45, 1 }
 0x369   : > { %v780_v48 = vadd.f32 %v779_v46, %v778_v44 }
 0x36a   : > { %v786_v49 = vadd.f32 %v785_v47, %v784_v45 }
 0x36b   : > { %1444 = vrcp.f32 %v780_v48 }
 0x36c   : > { %1446 = vrcp.f32 %v786_v49 }
 0x371   : > { %v1445_v50 = vpop.eup %1444 }
 0x372   : > { %v1447_v51 = vpop.eup %1446  ;;  %v789_v52 = vmul.f32 %v1445_v50, %v780_v48 }
 0x373   : > { %v790_v53 = vmul.f32 %v1447_v51, %v786_v49 }
 0x374   : > { %v791_v54 = vsub.f32 2.0, %v789_v52 }
 0x375   : > { %v792_v55 = vsub.f32 2.0, %v790_v53 }
 0x376   : > { %v793_v56 = vmul.f32 %v1445_v50, %v791_v54 }
 0x377   : > { %v794_v57 = vmul.f32 %v1447_v51, %v792_v55 }
 0x378   : > { %v795_v58 = vmul.f32 %v1441_v36, %v793_v56 }
 0x379   : > { %v796_v59 = vmul.f32 %v1443_v37, %v794_v57 }
 0x37a   : > { %797 = vxpose.xlu1.b32.start.end [1/1] (short) %v795_v58, 128 }
 0x37b   : > { %829 = vxpose.xlu2.b32.start.end [1/1] (short) %v796_v59, 128 }
 0x414   : > { %v845_v60 = vpop.trf.xlu2 }
 0x415   : > { %878 = vst.msk [vmem:[%s1773_s18 + $0x80] sm:$0xff] %vm861_vm3, %v845_v60 }
 0x41c   : > { %v846_v61 = vpop.trf.xlu2 }
 0x41d   : > { %879 = vst.msk [vmem:[%s1773_s18 + $0x88] sm:$0xff] %vm861_vm3, %v846_v61 }
 0x41e   : > { %v813_v62 = vpop.trf.xlu1 }
 0x41f   : > { %862 = vst.msk [vmem:[%s1773_s18] sm:$0xff] %vm861_vm3, %v813_v62 }
 0x424   : > { %v847_v63 = vpop.trf.xlu2 }
 0x425   : > { %880 = vst.msk [vmem:[%s1773_s18 + $0x90] sm:$0xff] %vm861_vm3, %v847_v63 }
 0x426   : > { %v814_v0 = vpop.trf.xlu1 }
 0x427   : > { %863 = vst.msk [vmem:[%s1773_s18 + $0x8] sm:$0xff] %vm861_vm3, %v814_v0 }
 0x42c   : > { %v848_v1 = vpop.trf.xlu2 }
 0x42d   : > { %881 = vst.msk [vmem:[%s1773_s18 + $0x98] sm:$0xff] %vm861_vm3, %v848_v1 }
 0x42e   : > { %v815_v2 = vpop.trf.xlu1 }
 0x42f   : > { %864 = vst.msk [vmem:[%s1773_s18 + $0x10] sm:$0xff] %vm861_vm3, %v815_v2 }
 0x434   : > { %v849_v3 = vpop.trf.xlu2 }
 0x435   : > { %882 = vst.msk [vmem:[%s1773_s18 + $0xa0] sm:$0xff] %vm861_vm3, %v849_v3 }
 0x436   : > { %v816_v4 = vpop.trf.xlu1 }
 0x437   : > { %865 = vst.msk [vmem:[%s1773_s18 + $0x18] sm:$0xff] %vm861_vm3, %v816_v4 }
 0x43c   : > { %v850_v5 = vpop.trf.xlu2 }
 0x43d   : > { %883 = vst.msk [vmem:[%s1773_s18 + $0xa8] sm:$0xff] %vm861_vm3, %v850_v5 }
 0x43e   : > { %v817_v6 = vpop.trf.xlu1 }
 0x43f   : > { %866 = vst.msk [vmem:[%s1773_s18 + $0x20] sm:$0xff] %vm861_vm3, %v817_v6 }
 0x444   : > { %v851_v7 = vpop.trf.xlu2 }
 0x445   : > { %884 = vst.msk [vmem:[%s1773_s18 + $0xb0] sm:$0xff] %vm861_vm3, %v851_v7 }
 0x446   : > { %v818_v8 = vpop.trf.xlu1 }
 0x447   : > { %867 = vst.msk [vmem:[%s1773_s18 + $0x28] sm:$0xff] %vm861_vm3, %v818_v8 }
 0x44c   : > { %v852_v9 = vpop.trf.xlu2 }
 0x44d   : > { %885 = vst.msk [vmem:[%s1773_s18 + $0xb8] sm:$0xff] %vm861_vm3, %v852_v9 }
 0x44e   : > { %v819_v10 = vpop.trf.xlu1 }
 0x44f   : > { %868 = vst.msk [vmem:[%s1773_s18 + $0x30] sm:$0xff] %vm861_vm3, %v819_v10 }
 0x454   : > { %v853_v11 = vpop.trf.xlu2 }
 0x455   : > { %886 = vst.msk [vmem:[%s1773_s18 + $0xc0] sm:$0xff] %vm861_vm3, %v853_v11 }
 0x456   : > { %v820_v12 = vpop.trf.xlu1 }
 0x457   : > { %869 = vst.msk [vmem:[%s1773_s18 + $0x38] sm:$0xff] %vm861_vm3, %v820_v12 }
 0x45c   : > { %v854_v13 = vpop.trf.xlu2 }
 0x45d   : > { %887 = vst.msk [vmem:[%s1773_s18 + $0xc8] sm:$0xff] %vm861_vm3, %v854_v13 }
 0x45e   : > { %v821_v14 = vpop.trf.xlu1 }
 0x45f   : > { %870 = vst.msk [vmem:[%s1773_s18 + $0x40] sm:$0xff] %vm861_vm3, %v821_v14 }
 0x464   : > { %v855_v15 = vpop.trf.xlu2 }
 0x465   : > { %888 = vst.msk [vmem:[%s1773_s18 + $0xd0] sm:$0xff] %vm861_vm3, %v855_v15 }
 0x466   : > { %v822_v16 = vpop.trf.xlu1 }
 0x467   : > { %871 = vst.msk [vmem:[%s1773_s18 + $0x48] sm:$0xff] %vm861_vm3, %v822_v16 }
 0x46c   : > { %v856_v17 = vpop.trf.xlu2 }
 0x46d   : > { %889 = vst.msk [vmem:[%s1773_s18 + $0xd8] sm:$0xff] %vm861_vm3, %v856_v17 }
 0x46e   : > { %v823_v18 = vpop.trf.xlu1 }
 0x46f   : > { %872 = vst.msk [vmem:[%s1773_s18 + $0x50] sm:$0xff] %vm861_vm3, %v823_v18 }
 0x474   : > { %v857_v19 = vpop.trf.xlu2 }
 0x475   : > { %890 = vst.msk [vmem:[%s1773_s18 + $0xe0] sm:$0xff] %vm861_vm3, %v857_v19 }
 0x476   : > { %v824_v20 = vpop.trf.xlu1 }
 0x477   : > { %873 = vst.msk [vmem:[%s1773_s18 + $0x58] sm:$0xff] %vm861_vm3, %v824_v20 }
 0x47c   : > { %v858_v21 = vpop.trf.xlu2 }
 0x47d   : > { %891 = vst.msk [vmem:[%s1773_s18 + $0xe8] sm:$0xff] %vm861_vm3, %v858_v21 }
 0x47e   : > { %v825_v22 = vpop.trf.xlu1 }
 0x47f   : > { %874 = vst.msk [vmem:[%s1773_s18 + $0x60] sm:$0xff] %vm861_vm3, %v825_v22 }
 0x484   : > { %v859_v23 = vpop.trf.xlu2 }
 0x485   : > { %892 = vst.msk [vmem:[%s1773_s18 + $0xf0] sm:$0xff] %vm861_vm3, %v859_v23 }
 0x486   : > { %v826_v24 = vpop.trf.xlu1 }
 0x487   : > { %875 = vst.msk [vmem:[%s1773_s18 + $0x68] sm:$0xff] %vm861_vm3, %v826_v24 }
 0x48c   : > { %v860_v25 = vpop.trf.xlu2 }
 0x48d   : > { %893 = vst.msk [vmem:[%s1773_s18 + $0xf8] sm:$0xff] %vm861_vm3, %v860_v25 }
 0x48e   : > { %v827_v26 = vpop.trf.xlu1 }
 0x48f   : > { %876 = vst.msk [vmem:[%s1773_s18 + $0x70] sm:$0xff] %vm861_vm3, %v827_v26 }
 0x493   : > { %900 = sbr.rel (!%p1582_p4) target bundleno = 1240 (0x4d8), region = 36 }
 0x496   : > { %v828_v27 = vpop.trf.xlu1 }
 0x497   : > { %877 = vst.msk [vmem:[%s1773_s18 + $0x78] sm:$0xff] %vm861_vm3, %v828_v27 }
 0x498   : > { %s1995_s12 = smov (!%p903_p8, %s902_s12), 32 }
 0x499   : > { %s1329_s27 = sshll.u32 %s1995_s12, 3 }
 0x49a   : > { %p1332_p9 = scmp.eq.s32.totalorder %s1329_s27, 0 }
 0x49b   : > { %s1852_s28 = sshrl.u32 (!%p1332_p9), %s1995_s12, 5 }
 0x49c   : > { %911 = sbr.rel (%p1332_p9) target bundleno = 1240 (0x4d8), region = 40  ;;  %p1333_p10 = scmp.le.s32.totalorder (!%p1332_p9), %s1852_s28, 0 }
 0x4a1   : > { %1190 = sbr.rel (%p1333_p10) target bundleno = 1223 (0x4c7), region = 124  ;;  %s1986_s15 = smov (!%p1333_p10), %s1846_s25 }
 0x4a2   : > { %s1987_s20 = smov (!%p1333_p10), %s1773_s18  ;;  %s1861_s21 = smov (!%p1333_p10), 0  }
 0x4a3   : > { %s1863_s29 = smov (!%p1333_p10), 0  }
 0x4a6 LB: >> { %v1036_v28 = vld [vmem:[%s1510_s20] sm:$0xff]  ;;  %v1038_v29 = vld [vmem:[%s1510_s20 + $0x8] sm:$0xff]  ;;  %v1040_v30 = vld [vmem:[%s1510_s20 + $0x10] sm:$0xff]  ;;  %s1100_s26 = sadd.s32 1, %s1514_s21  ;;  %s1030_s29 = sadd.s32 1, %s1518_s29   ;;  %s1518_s29 = sphi %s1863_s29, %s1030_s29   ;;  %s1514_s21 = sphi %s1861_s21, %s1990_s21   ;;  %s1510_s20 = sphi %s1987_s20, %s1989_s20   ;;  %s1506_s15 = sphi %s1986_s15, %s1988_s15  }
 0x4a7   : >> { %1037 = vst [vmem:[%s1506_s15] sm:$0xff] %v1036_v28  ;;  %v1042_v31 = vld [vmem:[%s1510_s20 + $0x18] sm:$0xff]  ;;  %p1101_p11 = scmp.ge.s32.totalorder %s1100_s26, %s1852_s28  ;;  %v1044_v32 = vld [vmem:[%s1510_s20 + $0x20] sm:$0xff]  ;;  %v1046_v33 = vld [vmem:[%s1510_s20 + $0x28] sm:$0xff]  ;;  %p1029_p12 = scmp.ge.s32.totalorder %s1030_s29, %s1852_s28 }
 0x4a8   : >> { %1039 = vst [vmem:[%s1506_s15 + $0x8] sm:$0xff] %v1038_v29  ;;  %v1048_v34 = vld [vmem:[%s1510_s20 + $0x30] sm:$0xff]  ;;  %v1050_v35 = vld [vmem:[%s1510_s20 + $0x38] sm:$0xff]  ;;  %v1052_v36 = vld [vmem:[%s1510_s20 + $0x40] sm:$0xff] }
 0x4a9   : >> { %1041 = vst [vmem:[%s1506_s15 + $0x10] sm:$0xff] %v1040_v30  ;;  %s1997_s26 = smov (%p1101_p11, %s1100_s26), 0  ;;  %v1054_v37 = vld [vmem:[%s1510_s20 + $0x48] sm:$0xff]  ;;  %v1056_v38 = vld [vmem:[%s1510_s20 + $0x50] sm:$0xff]  ;;  %v1058_v39 = vld [vmem:[%s1510_s20 + $0x58] sm:$0xff] }
 0x4aa   : >> { %1043 = vst [vmem:[%s1506_s15 + $0x18] sm:$0xff] %v1042_v31  ;;  %s1334_s30 = sshll.u32 %s1997_s26, 8  ;;  %v1060_v40 = vld [vmem:[%s1510_s20 + $0x60] sm:$0xff]  ;;  %v1062_v41 = vld [vmem:[%s1510_s20 + $0x68] sm:$0xff]  ;;  %v1064_v42 = vld [vmem:[%s1510_s20 + $0x70] sm:$0xff]  ;;  %s1990_s21 = smov %s1997_s26 }
 0x4ab   : >> { %1045 = vst [vmem:[%s1506_s15 + $0x20] sm:$0xff] %v1044_v32  ;;  %s1895_s4 = scalar_lea.vmem %s1773_s18, %s1334_s30 [#allocation2]   ;;  %s1898_s5 = scalar_lea.vmem %s1846_s25, %s1334_s30   ;;  %v1066_v43 = vld [vmem:[%s1510_s20 + $0x78] sm:$0xff]  ;;  %v1068_v44 = vld [vmem:[%s1510_s20 + $0x80] sm:$0xff]  ;;  %v1070_v45 = vld [vmem:[%s1510_s20 + $0x88] sm:$0xff] }
 0x4ac   : >> { %1047 = vst [vmem:[%s1506_s15 + $0x28] sm:$0xff] %v1046_v33  ;;  %v1072_v46 = vld [vmem:[%s1510_s20 + $0x90] sm:$0xff]  ;;  %v1074_v47 = vld [vmem:[%s1510_s20 + $0x98] sm:$0xff]  ;;  %v1076_v48 = vld [vmem:[%s1510_s20 + $0xa0] sm:$0xff] }
 0x4ad   : >> { %1049 = vst [vmem:[%s1506_s15 + $0x30] sm:$0xff] %v1048_v34  ;;  %v1078_v49 = vld [vmem:[%s1510_s20 + $0xa8] sm:$0xff]  ;;  %v1080_v50 = vld [vmem:[%s1510_s20 + $0xb0] sm:$0xff]  ;;  %v1082_v51 = vld [vmem:[%s1510_s20 + $0xb8] sm:$0xff] }
 0x4ae   : >> { %1051 = vst [vmem:[%s1506_s15 + $0x38] sm:$0xff] %v1050_v35  ;;  %v1084_v52 = vld [vmem:[%s1510_s20 + $0xc0] sm:$0xff]  ;;  %v1086_v53 = vld [vmem:[%s1510_s20 + $0xc8] sm:$0xff]  ;;  %v1088_v54 = vld [vmem:[%s1510_s20 + $0xd0] sm:$0xff] }
 0x4af   : >> { %1053 = vst [vmem:[%s1506_s15 + $0x40] sm:$0xff] %v1052_v36  ;;  %v1090_v55 = vld [vmem:[%s1510_s20 + $0xd8] sm:$0xff]  ;;  %v1092_v56 = vld [vmem:[%s1510_s20 + $0xe0] sm:$0xff]  ;;  %v1094_v57 = vld [vmem:[%s1510_s20 + $0xe8] sm:$0xff] }
 0x4b0   : >> { %1055 = vst [vmem:[%s1506_s15 + $0x48] sm:$0xff] %v1054_v37  ;;  %v1096_v58 = vld [vmem:[%s1510_s20 + $0xf0] sm:$0xff]  ;;  %v1098_v59 = vld [vmem:[%s1510_s20 + $0xf8] sm:$0xff]  ;;  %s1989_s20 = smov %s1895_s4 }
 0x4b1   : >> { %1057 = vst [vmem:[%s1506_s15 + $0x50] sm:$0xff] %v1056_v38 }
 0x4b2   : >> { %1059 = vst [vmem:[%s1506_s15 + $0x58] sm:$0xff] %v1058_v39 }
 0x4b3   : >> { %1061 = vst [vmem:[%s1506_s15 + $0x60] sm:$0xff] %v1060_v40 }
 0x4b4   : >> { %1063 = vst [vmem:[%s1506_s15 + $0x68] sm:$0xff] %v1062_v41 }
 0x4b5   : >> { %1065 = vst [vmem:[%s1506_s15 + $0x70] sm:$0xff] %v1064_v42 }
 0x4b6   : >> { %1067 = vst [vmem:[%s1506_s15 + $0x78] sm:$0xff] %v1066_v43 }
 0x4b7   : >> { %1069 = vst [vmem:[%s1506_s15 + $0x80] sm:$0xff] %v1068_v44 }
 0x4b8   : >> { %1071 = vst [vmem:[%s1506_s15 + $0x88] sm:$0xff] %v1070_v45 }
 0x4b9   : >> { %1073 = vst [vmem:[%s1506_s15 + $0x90] sm:$0xff] %v1072_v46 }
 0x4ba   : >> { %1075 = vst [vmem:[%s1506_s15 + $0x98] sm:$0xff] %v1074_v47 }
 0x4bb   : >> { %1077 = vst [vmem:[%s1506_s15 + $0xa0] sm:$0xff] %v1076_v48 }
 0x4bc   : >> { %1079 = vst [vmem:[%s1506_s15 + $0xa8] sm:$0xff] %v1078_v49 }
 0x4bd   : >> { %1081 = vst [vmem:[%s1506_s15 + $0xb0] sm:$0xff] %v1080_v50 }
 0x4be   : >> { %1083 = vst [vmem:[%s1506_s15 + $0xb8] sm:$0xff] %v1082_v51 }
 0x4bf   : >> { %1085 = vst [vmem:[%s1506_s15 + $0xc0] sm:$0xff] %v1084_v52 }
 0x4c0   : >> { %1087 = vst [vmem:[%s1506_s15 + $0xc8] sm:$0xff] %v1086_v53 }
 0x4c1   : >> { %1089 = vst [vmem:[%s1506_s15 + $0xd0] sm:$0xff] %v1088_v54 }
 0x4c2   : >> { %1091 = vst [vmem:[%s1506_s15 + $0xd8] sm:$0xff] %v1090_v55  ;;  %1032 = sbr.rel (!%p1029_p12) target bundleno = 1190 (0x4a6), region = 130 }
 0x4c3   : >> { %1093 = vst [vmem:[%s1506_s15 + $0xe0] sm:$0xff] %v1092_v56 }
 0x4c4   : >> { %1095 = vst [vmem:[%s1506_s15 + $0xe8] sm:$0xff] %v1094_v57 }
 0x4c5   : >> { %1097 = vst [vmem:[%s1506_s15 + $0xf0] sm:$0xff] %v1096_v58 }
 0x4c6   : >> { %1099 = vst [vmem:[%s1506_s15 + $0xf8] sm:$0xff] %v1098_v59  ;;  %s1988_s15 = smov %s1898_s5 }
 0x4c7 PF: > { %s1963_s6 = sand.u32 31, %s1995_s12   ;;  %s1345_s7 = sshll.u32 %s1852_s28, 8 }
 0x4c8   : > { %s1111_s8 = scalar_lea.vmem %s1773_s18, %s1345_s7 [#allocation2]   ;;  %s1113_s9 = scalar_lea.vmem %s1846_s25, %s1345_s7  }
 0x4c9   : > { %p1339_p13 = scmp.le.s32.totalorder %s1963_s6, 0 }
 0x4ca   : > { %s1520_s10 = smov (!%p1339_p13), %s1113_s9   ;;  %s1524_s11 = smov (!%p1339_p13), %s1111_s8  }
 0x4cb   : > { %1204 = sbr.rel (%p1339_p13) target bundleno = 1240 (0x4d8), region = 135  ;;  %s1528_s14 = smov (!%p1339_p13), 0  }
 0x4cc   : > { %s1532_s17 = smov (!%p1339_p13), 0  }
 0x4d0 LB: >> { %v1123_v60 = vld [vmem:[%s1526_s11] sm:$0xff]  ;;  %s1125_s12 = sadd.s32 1, %s1530_s14  ;;  %s1117_s17 = sadd.s32 1, %s1534_s17   ;;  %s1534_s17 = sphi %s1532_s17, %s1117_s17   ;;  %s1530_s14 = sphi %s1528_s14, %s1529_s14   ;;  %s1526_s11 = sphi %s1524_s11, %s1130_s11   ;;  %s1522_s10 = sphi %s1520_s10, %s1131_s10  }
 0x4d1   : >> { %1124 = vst [vmem:[%s1522_s10] sm:$0xff] %v1123_v60  ;;  %p1126_p0 = scmp.ge.s32.totalorder %s1125_s12, %s1963_s6  ;;  %p1116_p1 = scmp.ge.s32.totalorder %s1117_s17, %s1963_s6 }
 0x4d3   : >> { %s1999_s12 = smov (%p1126_p0, %s1125_s12), 0  ;;  %1119 = sbr.rel (!%p1116_p1) target bundleno = 1232 (0x4d0), region = 141 }
 0x4d4   : >> { %s1340_s18 = sshll.u32 %s1999_s12, 3  ;;  %s1529_s14 = smov %s1999_s12  }
 0x4d5   : >> { %s1130_s11 = scalar_lea.vmem %s1111_s8, %s1340_s18 [#allocation2]   ;;  %s1131_s10 = scalar_lea.vmem %s1113_s9, %s1340_s18  }
 0x4d8 PF: > { %p10_p2 = scmp.ge.s32.totalorder %s1572_s16, 4   ;;  %s1991_s12 = smov %s1498_s13 }
 0x4d9   : > { %s1992_s13 = smov %s1580_s19  ;;  %s1993_s14 = smov %s1572_s16 }
 0x4da   :  { %12 = sbr.rel (!%p10_p2) target bundleno = 2 (0x2), region = 152 }

</bundles_post_ra>
